<compile_context>
chip_gen: v5e
topology: v5e:2x2
jax: 0.10.0
libtpu: 0.0.40
codegen_flags: <defaults>
</compile_context>

<pallas_src>
import jax
import jax.numpy as jnp
from jax.experimental import pallas as pl
from jax.experimental.pallas import tpu as pltpu

HIDDEN_SIZE = 256
STATE_DIM = 376          # Humanoid-v4 observation dim
STATE_DIM_PAD = 384      # padded to a multiple of 128 for the fc1 K dimension
ACTION_DIM = 17          # Humanoid-v4 action dim
HEAD_WIDTH = 128         # fused (mean|log_std) head, padded lane-dense to 128


def _round_up(x, m):
    return (x + m - 1) // m * m


def actor_kernel(state_ref,
                 w1_ref, b1_ref,
                 w2_ref, b2_ref,
                 wh_ref, bh_ref,
                 out_ref):
    # fc1 + relu  (bf16 operands, f32 accumulate; bias add / relu on f32 VPU path)
    x = state_ref[...].astype(jnp.bfloat16)
    h1 = jnp.dot(x, w1_ref[...], preferred_element_type=jnp.float32) + b1_ref[...]
    h1 = jnp.maximum(h1, 0.0)

    # fc2 + relu
    h2 = jnp.dot(h1.astype(jnp.bfloat16), w2_ref[...],
                 preferred_element_type=jnp.float32) + b2_ref[...]
    h2 = jnp.maximum(h2, 0.0)

    # fused (mean | log_std | pad) head: one matmul, one lane-dense store
    head = jnp.dot(h2.astype(jnp.bfloat16), wh_ref[...],
                   preferred_element_type=jnp.float32) + bh_ref[...]

    # clamp only the log_std lanes (and the zero-pad lanes, which get sliced off)
    lane = jax.lax.broadcasted_iota(jnp.int32, head.shape, 1)
    clamped = jnp.clip(head, -20.0, 2.0)
    out_ref[...] = jnp.where(lane >= ACTION_DIM, clamped, head)


def pack_params(params):
    """Pack raw f32 params into the kernel layout (one-time, outside hot path).

    * w1 rows zero-padded 376 -> 384, cast bf16.
    * mean / log_std head weights concatenated + zero-padded to 128 lanes, bf16.
    * biases stay f32; head biases fused into one (1, 128) row.
    """
    w1, b1, w2, b2, wm, bm, ws, bs = params

    w1p = jnp.zeros((STATE_DIM_PAD, HIDDEN_SIZE), jnp.float32).at[:STATE_DIM].set(w1)

    wh = jnp.zeros((HIDDEN_SIZE, HEAD_WIDTH), jnp.float32)
    wh = wh.at[:, :ACTION_DIM].set(wm).at[:, ACTION_DIM:2 * ACTION_DIM].set(ws)
    bh = jnp.zeros((1, HEAD_WIDTH), jnp.float32)
    bh = bh.at[:, :ACTION_DIM].set(bm).at[:, ACTION_DIM:2 * ACTION_DIM].set(bs)

    return (w1p.astype(jnp.bfloat16), b1,
            w2.astype(jnp.bfloat16), b2,
            wh.astype(jnp.bfloat16), bh)


def actor_forward(state, packed, *, batch_tile=128):
    """Actor forward pass. Returns (mean, log_std), each (B, ACTION_DIM) f32."""
    assert state.shape[1] == STATE_DIM
    B = state.shape[0]
    w1, b1, w2, b2, wh, bh = packed

    # batch tile: large batches get 128-row tiles across a parallel grid,
    # tiny batches get a single padded-to-8 tile.
    TB = batch_tile if B >= batch_tile else _round_up(B, 8)
    B_pad = _round_up(B, TB)

    # zero-pad batch rows and state columns (matches zero-padded w1 rows)
    state_p = jnp.zeros((B_pad, STATE_DIM_PAD), jnp.float32).at[:B, :STATE_DIM].set(state)

    const = lambda i: (0, 0)   # weights/biases: same block every grid step (VMEM-resident)
    out = pl.pallas_call(
        actor_kernel,
        out_shape=jax.ShapeDtypeStruct((B_pad, HEAD_WIDTH), jnp.float32),
        grid=(B_pad // TB,),
        in_specs=[
            pl.BlockSpec((TB, STATE_DIM_PAD), lambda i: (i, 0)),
            pl.BlockSpec((STATE_DIM_PAD, HIDDEN_SIZE), const),
            pl.BlockSpec((1, HIDDEN_SIZE), const),
            pl.BlockSpec((HIDDEN_SIZE, HIDDEN_SIZE), const),
            pl.BlockSpec((1, HIDDEN_SIZE), const),
            pl.BlockSpec((HIDDEN_SIZE, HEAD_WIDTH), const),
            pl.BlockSpec((1, HEAD_WIDTH), const),
        ],
        out_specs=pl.BlockSpec((TB, HEAD_WIDTH), lambda i: (i, 0)),
        compiler_params=pltpu.CompilerParams(
            dimension_semantics=("parallel",)),
    )(state_p, w1, b1, w2, b2, wh, bh)

    mean = out[:B, :ACTION_DIM]
    log_std = out[:B, ACTION_DIM:2 * ACTION_DIM]
    return mean, log_std


def init_params(key):
    """Deterministic synthetic init (shapes match the nn.Linear layers, transposed)."""
    ks = jax.random.split(key, 8)

    def dense(kw, kb, fan_in, fan_out):
        scale = 1.0 / jnp.sqrt(jnp.float32(fan_in))
        w = jax.random.uniform(kw, (fan_in, fan_out), jnp.float32, -scale, scale)
        b = jax.random.uniform(kb, (1, fan_out), jnp.float32, -scale, scale)
        return w, b

    w1, b1 = dense(ks[0], ks[1], STATE_DIM, HIDDEN_SIZE)
    w2, b2 = dense(ks[2], ks[3], HIDDEN_SIZE, HIDDEN_SIZE)
    wm, bm = dense(ks[4], ks[5], HIDDEN_SIZE, ACTION_DIM)
    ws, bs = dense(ks[6], ks[7], HIDDEN_SIZE, ACTION_DIM)
    return (w1, b1, w2, b2, wm, bm, ws, bs)


def reference_forward(state, packed):
    """Pure-JAX reference using the same packed (bf16) weights / f32 accumulation."""
    w1, b1, w2, b2, wh, bh = packed
    x = jnp.zeros((state.shape[0], STATE_DIM_PAD), jnp.float32).at[:, :STATE_DIM].set(state)
    h1 = jnp.maximum(
        jnp.dot(x.astype(jnp.bfloat16), w1, preferred_element_type=jnp.float32) + b1, 0.0)
    h2 = jnp.maximum(
        jnp.dot(h1.astype(jnp.bfloat16), w2, preferred_element_type=jnp.float32) + b2, 0.0)
    head = jnp.dot(h2.astype(jnp.bfloat16), wh, preferred_element_type=jnp.float32) + bh
    mean = head[:, :ACTION_DIM]
    log_std = jnp.clip(head[:, ACTION_DIM:2 * ACTION_DIM], -20.0, 2.0)
    return mean, log_std


if __name__ == "__main__":
    key = jax.random.PRNGKey(0)
    k_params, k_state = jax.random.split(key)

    params = init_params(k_params)
    packed = pack_params(params)

    batch = 8
    state = jax.random.normal(k_state, (batch, STATE_DIM), jnp.float32)

    mean, log_std = jax.block_until_ready(actor_forward(state, packed))

    # correctness check against a pure-JAX reference with identical precision
    mean_ref, log_std_ref = reference_forward(state, packed)
    assert mean.shape == (batch, ACTION_DIM)
    assert log_std.shape == (batch, ACTION_DIM)
    assert jnp.allclose(mean, mean_ref, atol=1e-3, rtol=1e-3)
    assert jnp.allclose(log_std, log_std_ref, atol=1e-3, rtol=1e-3)
    assert jnp.all(log_std <= 2.0) and jnp.all(log_std >= -20.0)

    # TODO(synk): Actor.sample (rsample + tanh squash + log_prob) is host-side
    # distribution logic, not part of forward(); not implemented in-kernel.
    print("KERNEL_OK")
</pallas_src>

<mosaic_0001>
module attributes {stable_mosaic.version = 11 : i64} {
  func.func @actor_kernel(%arg0: i32, %arg1: memref<8x384xf32, #tpu.memory_space<vmem>>, %arg2: memref<384x256xbf16, #tpu.memory_space<vmem>>, %arg3: memref<1x256xf32, #tpu.memory_space<vmem>>, %arg4: memref<256x256xbf16, #tpu.memory_space<vmem>>, %arg5: memref<1x256xf32, #tpu.memory_space<vmem>>, %arg6: memref<256x128xbf16, #tpu.memory_space<vmem>>, %arg7: memref<1x128xf32, #tpu.memory_space<vmem>>, %arg8: memref<8x128xf32, #tpu.memory_space<vmem>>) attributes {dimension_semantics = [#tpu.dimension_semantics<parallel>], iteration_bounds = array<i64: 1>, scalar_prefetch = 0 : i64, scratch_operands = 0 : i64, tpu.core_type = #tpu.core_type<tc>, window_params = [{transform_indices = @transform_0, window_bounds = array<i64: 8, 384>}, {pipeline_mode = #tpu.pipeline_mode<synchronous>, transform_indices = @transform_1, window_bounds = array<i64: 384, 256>}, {pipeline_mode = #tpu.pipeline_mode<synchronous>, transform_indices = @transform_2, window_bounds = array<i64: 1, 256>}, {pipeline_mode = #tpu.pipeline_mode<synchronous>, transform_indices = @transform_3, window_bounds = array<i64: 256, 256>}, {pipeline_mode = #tpu.pipeline_mode<synchronous>, transform_indices = @transform_4, window_bounds = array<i64: 1, 256>}, {pipeline_mode = #tpu.pipeline_mode<synchronous>, transform_indices = @transform_5, window_bounds = array<i64: 256, 128>}, {pipeline_mode = #tpu.pipeline_mode<synchronous>, transform_indices = @transform_6, window_bounds = array<i64: 1, 128>}, {transform_indices = @transform_7, window_bounds = array<i64: 8, 128>}]} {
    %c0 = arith.constant 0 : index
    %c0_0 = arith.constant 0 : index
    %0 = vector.load %arg1[%c0, %c0_0] : memref<8x384xf32, #tpu.memory_space<vmem>>, vector<8x384xf32>
    %1 = arith.truncf %0 : vector<8x384xf32> to vector<8x384xbf16>
    %c0_1 = arith.constant 0 : index
    %c0_2 = arith.constant 0 : index
    %2 = vector.load %arg2[%c0_1, %c0_2] : memref<384x256xbf16, #tpu.memory_space<vmem>>, vector<384x256xbf16>
    %cst = arith.constant dense<0.000000e+00> : vector<8x256xf32>
    %3 = tpu.matmul %1, %2, %cst {dimension_numbers = #tpu.dot_dimension_numbers<[1], [0], [0], [1], [0, 0, 1, 1], [], []>} : vector<8x384xbf16>, vector<384x256xbf16>, vector<8x256xf32> -> vector<8x256xf32>
    %c0_3 = arith.constant 0 : index
    %c0_4 = arith.constant 0 : index
    %4 = vector.load %arg3[%c0_3, %c0_4] : memref<1x256xf32, #tpu.memory_space<vmem>>, vector<1x256xf32>
    %5 = vector.broadcast %4 : vector<1x256xf32> to vector<8x256xf32>
    %6 = arith.addf %3, %5 : vector<8x256xf32>
    %cst_5 = arith.constant 0.000000e+00 : f32
    %7 = vector.broadcast %cst_5 : f32 to vector<8x256xf32>
    %8 = arith.maximumf %6, %7 : vector<8x256xf32>
    %9 = arith.truncf %8 : vector<8x256xf32> to vector<8x256xbf16>
    %c0_6 = arith.constant 0 : index
    %c0_7 = arith.constant 0 : index
    %10 = vector.load %arg4[%c0_6, %c0_7] : memref<256x256xbf16, #tpu.memory_space<vmem>>, vector<256x256xbf16>
    %cst_8 = arith.constant dense<0.000000e+00> : vector<8x256xf32>
    %11 = tpu.matmul %9, %10, %cst_8 {dimension_numbers = #tpu.dot_dimension_numbers<[1], [0], [0], [1], [0, 0, 1, 1], [], []>} : vector<8x256xbf16>, vector<256x256xbf16>, vector<8x256xf32> -> vector<8x256xf32>
    %c0_9 = arith.constant 0 : index
    %c0_10 = arith.constant 0 : index
    %12 = vector.load %arg5[%c0_9, %c0_10] : memref<1x256xf32, #tpu.memory_space<vmem>>, vector<1x256xf32>
    %13 = vector.broadcast %12 : vector<1x256xf32> to vector<8x256xf32>
    %14 = arith.addf %11, %13 : vector<8x256xf32>
    %cst_11 = arith.constant 0.000000e+00 : f32
    %15 = vector.broadcast %cst_11 : f32 to vector<8x256xf32>
    %16 = arith.maximumf %14, %15 : vector<8x256xf32>
    %17 = arith.truncf %16 : vector<8x256xf32> to vector<8x256xbf16>
    %c0_12 = arith.constant 0 : index
    %c0_13 = arith.constant 0 : index
    %18 = vector.load %arg6[%c0_12, %c0_13] : memref<256x128xbf16, #tpu.memory_space<vmem>>, vector<256x128xbf16>
    %cst_14 = arith.constant dense<0.000000e+00> : vector<8x128xf32>
    %19 = tpu.matmul %17, %18, %cst_14 {dimension_numbers = #tpu.dot_dimension_numbers<[1], [0], [0], [1], [0, 0, 1, 1], [], []>} : vector<8x256xbf16>, vector<256x128xbf16>, vector<8x128xf32> -> vector<8x128xf32>
    %c0_15 = arith.constant 0 : index
    %c0_16 = arith.constant 0 : index
    %20 = vector.load %arg7[%c0_15, %c0_16] : memref<1x128xf32, #tpu.memory_space<vmem>>, vector<1x128xf32>
    %21 = vector.broadcast %20 : vector<1x128xf32> to vector<8x128xf32>
    %22 = arith.addf %19, %21 : vector<8x128xf32>
    %23 = tpu.iota {dimensions = array<i32: 1>} : vector<8x128xi32>
    %cst_17 = arith.constant -2.000000e+01 : f32
    %cst_18 = arith.constant 2.000000e+00 : f32
    %24 = vector.broadcast %cst_17 : f32 to vector<8x128xf32>
    %25 = arith.maximumf %24, %22 : vector<8x128xf32>
    %26 = vector.broadcast %cst_18 : f32 to vector<8x128xf32>
    %27 = arith.minimumf %26, %25 : vector<8x128xf32>
    %c17_i32 = arith.constant 17 : i32
    %28 = vector.broadcast %c17_i32 : i32 to vector<8x128xi32>
    %29 = arith.cmpi sge, %23, %28 : vector<8x128xi32>
    %30 = arith.select %29, %27, %22 : vector<8x128xi1>, vector<8x128xf32>
    %c0_19 = arith.constant 0 : index
    %c0_20 = arith.constant 0 : index
    %31 = vector.load %arg8[%c0_19, %c0_20] : memref<8x128xf32, #tpu.memory_space<vmem>>, vector<8x128xf32>
    tpu.vector_store %arg8[%c0_19, %c0_20], %30 {strides = array<i32>} : memref<8x128xf32, #tpu.memory_space<vmem>>, vector<8x128xf32>,
    return
  }
  func.func @transform_0(%arg0: i32) -> (i32, i32) {
    %c0_i32 = arith.constant 0 : i32
    %c0_i32_0 = arith.constant 0 : i32
    return %arg0, %c0_i32 : i32, i32
  }
  func.func @transform_1(%arg0: i32) -> (i32, i32) {
    %c0_i32 = arith.constant 0 : i32
    %c0_i32_0 = arith.constant 0 : i32
    %c0_i32_1 = arith.constant 0 : i32
    return %c0_i32, %c0_i32_0 : i32, i32
  }
  func.func @transform_2(%arg0: i32) -> (i32, i32) {
    %c0_i32 = arith.constant 0 : i32
    %c0_i32_0 = arith.constant 0 : i32
    %c0_i32_1 = arith.constant 0 : i32
    return %c0_i32, %c0_i32_0 : i32, i32
  }
  func.func @transform_3(%arg0: i32) -> (i32, i32) {
    %c0_i32 = arith.constant 0 : i32
    %c0_i32_0 = arith.constant 0 : i32
    %c0_i32_1 = arith.constant 0 : i32
    return %c0_i32, %c0_i32_0 : i32, i32
  }
  func.func @transform_4(%arg0: i32) -> (i32, i32) {
    %c0_i32 = arith.constant 0 : i32
    %c0_i32_0 = arith.constant 0 : i32
    %c0_i32_1 = arith.constant 0 : i32
    return %c0_i32, %c0_i32_0 : i32, i32
  }
  func.func @transform_5(%arg0: i32) -> (i32, i32) {
    %c0_i32 = arith.constant 0 : i32
    %c0_i32_0 = arith.constant 0 : i32
    %c0_i32_1 = arith.constant 0 : i32
    return %c0_i32, %c0_i32_0 : i32, i32
  }
  func.func @transform_6(%arg0: i32) -> (i32, i32) {
    %c0_i32 = arith.constant 0 : i32
    %c0_i32_0 = arith.constant 0 : i32
    %c0_i32_1 = arith.constant 0 : i32
    return %c0_i32, %c0_i32_0 : i32, i32
  }
  func.func @transform_7(%arg0: i32) -> (i32, i32) {
    %c0_i32 = arith.constant 0 : i32
    %c0_i32_0 = arith.constant 0 : i32
    return %arg0, %c0_i32 : i32, i32
  }
}

</mosaic_0001>

<bundles_post_ra>
// kernel: tpu_custom_call.1
= control target key start
LH: loop header
LB: loop body
LE: loop exit
PB: predicated region body
PF: predicated region fallthrough
CT: control target
= control target key end

     0   :  { %12 = vsyncpa [#allocation3], 0  ;;  %s1646_s0 = inlined_call_operand.hbm [shape: f32[8,384], index: 0, kind: input, shape index: {}]   ;;  %s1647_s1 = inlined_call_operand.hbm [shape: bf16[384,256], index: 1, kind: input, shape index: {}]   ;;  %s1648_s2 = inlined_call_operand.hbm [shape: f32[1,256], index: 2, kind: input, shape index: {}]   ;;  %s1649_s3 = inlined_call_operand.hbm [shape: bf16[256,256], index: 3, kind: input, shape index: {}]   ;;  %s1650_s4 = inlined_call_operand.vmem [shape: f32[1,256], index: 4, kind: input, shape index: {}]   ;;  %s1651_s5 = inlined_call_operand.hbm [shape: bf16[256,128], index: 5, kind: input, shape index: {}]   ;;  %s1652_s6 = inlined_call_operand.vmem [shape: f32[1,128], index: 6, kind: input, shape index: {}]   ;;  %s1653_s7 = inlined_call_operand.hbm [shape: f32[8,128], index: 7, kind: output, shape index: {}]  }
   0x1   :  { %13 = vsyncpa [#allocation6], 0 }
   0x2   :  { %14 = vsyncpa [#allocation9], 0  ;;  %s31_s26 = sshll.u32 %s1647_s1, 4  ;;  %s32_s26 = int_to_ptr.hbm [resolvable:$true] %s31_s26 }
   0x3   :  { %15 = vsyncpa [#allocation4], 0  ;;  %s1564_s27 = smov [#allocation5]   ;;  %s55_s8 = sshll.u32 %s1649_s3, 4  ;;  %s56_s8 = int_to_ptr.hbm [resolvable:$true] %s55_s8 }
   0x4   :  { %s33_s28 = sshll.u32 %s1564_s27, 4  ;;  %s1565_s9 = smov 128   ;;  %s34_s28 = int_to_ptr.vmem [resolvable:$true] %s33_s28 }
   0x5   :  { %s1566_s10 = smov 8   ;;  %s1567_s11 = smov [#allocation8]  }
   0x6   :  { %39 = dma.hbm_to_vmem [thread:$0]  %s32_s26, 6144, %s34_s28, [#allocation6], %s1565_s9, %s1565_s9, %s1566_s10  }
   0x7   :  { %s57_s12 = sshll.u32 %s1567_s11, 4  ;;  %s21_s15 = sshll.u32 %s1646_s0, 4  ;;  %s58_s12 = int_to_ptr.vmem [resolvable:$true] %s57_s12  ;;  %s22_s15 = int_to_ptr.hbm [resolvable:$true] %s21_s15 }
   0x8   :  { %63 = dma.hbm_to_vmem [thread:$0]  %s56_s8, 4096, %s58_s12, [#allocation9], %s1565_s9, %s1565_s9, %s1566_s10  }
   0x9   :  { %s45_s17 = sshll.u32 %s1648_s2, 4  ;;  %s1568_s18 = smov [#allocation2]   ;;  %s46_s17 = int_to_ptr.hbm [resolvable:$true] %s45_s17 }
   0xa   :  { %s23_s19 = sshll.u32 %s1568_s18, 4  ;;  %s1569_s3 = smov [#allocation7]   ;;  %s24_s19 = int_to_ptr.vmem [resolvable:$true] %s23_s19 }
   0xb   :  { %26 = dma.hbm_to_vmem [thread:$0]  %s22_s15, 384, %s24_s19, [#allocation3]  }
   0xc   :  { %s47_s20 = sshll.u32 %s1569_s3, 4  ;;  %s70_s23 = sshll.u32 %s1651_s5, 4  ;;  %s48_s20 = int_to_ptr.vmem [resolvable:$true] %s47_s20  ;;  %s71_s23 = int_to_ptr.hbm [resolvable:$true] %s70_s23 }
   0xd   :  { %50 = dma.hbm_to_vmem [thread:$0]  %s46_s17, 32, %s48_s20, [#allocation6]  }
   0xe   :  { %s1570_s0 = smov [#allocation10]   ;;  %s1571_s25 = smov 64  }
   0xf   :  { %s72_s24 = sshll.u32 %s1570_s0, 4  ;;  %s1572_s26 = smov 4   ;;  %s73_s24 = int_to_ptr.vmem [resolvable:$true] %s72_s24 }
  0x10   :  { %78 = dma.hbm_to_vmem [thread:$0]  %s71_s23, 2048, %s73_s24, [#allocation9], %s1571_s25, %s1571_s25, %s1572_s26  }
  0x11   :  { %1556 = dma.done.wait [#allocation3], 384  }
  0x12   :  { %1557 = vsyncadd [#allocation3], 4294966912 }
  0x13   :  { %1558 = dma.done.wait [#allocation6], 6176  }
  0x14   :  { %1559 = vsyncadd [#allocation6], 4294961120 }
  0x15   :  { %1560 = dma.done.wait [#allocation9], 6144  }
  0x16   :  { %1561 = vsyncadd [#allocation9], 4294961152  ;;  %v979_v0 = vld [vmem:[#allocation5 + $0x70] sm:$0xf]  ;;  %v1320_v1 = vld [vmem:[#allocation5 + $0x74] sm:$0xf0] }
  0x17   :  { %v1043_v2 = vld [vmem:[#allocation5 + $0xf0] sm:$0xf]  ;;  %v980_v3 = vor.u32 %v1320_v1, %v979_v0  ;;  %v1336_v4 = vld [vmem:[#allocation5 + $0xf4] sm:$0xf0]  ;;  %v971_v9 = vld [vmem:[#allocation5 + $0x60] sm:$0xf] }
  0x18   :  { %v1107_v5 = vld [vmem:[#allocation5 + $0x170] sm:$0xf]  ;;  %v1352_v6 = vld [vmem:[#allocation5 + $0x174] sm:$0xf0]  ;;  %v1044_v7 = vor.u32 %v1336_v4, %v1043_v2  ;;  %v1318_v10 = vld [vmem:[#allocation5 + $0x64] sm:$0xf0] }
  0x19   :  { %v1108_v8 = vor.u32 %v1352_v6, %v1107_v5  ;;  %v1035_v11 = vld [vmem:[#allocation5 + $0xe0] sm:$0xf]  ;;  %401 = vmatpush.bf16.msra.mxu0 %v980_v3  ;;  %v972_v12 = vor.u32 %v1318_v10, %v971_v9  ;;  %v1334_v13 = vld [vmem:[#allocation5 + $0xe4] sm:$0xf0]  ;;  %v963_v18 = vld [vmem:[#allocation5 + $0x50] sm:$0xf] }
  0x1a   :  { %v1099_v14 = vld [vmem:[#allocation5 + $0x160] sm:$0xf]  ;;  %v1350_v15 = vld [vmem:[#allocation5 + $0x164] sm:$0xf0]  ;;  %414 = vmatpush.bf16.msra.mxu1 %v1044_v7  ;;  %v1036_v16 = vor.u32 %v1334_v13, %v1035_v11  ;;  %v1316_v19 = vld [vmem:[#allocation5 + $0x54] sm:$0xf0] }
  0x1b   :  { %427 = vmatpush.bf16.msra.mxu2 %v1108_v8  ;;  %v1100_v17 = vor.u32 %v1350_v15, %v1099_v14  ;;  %v1027_v20 = vld [vmem:[#allocation5 + $0xd0] sm:$0xf]  ;;  %v1332_v21 = vld [vmem:[#allocation5 + $0xd4] sm:$0xf0]  ;;  %v964_v24 = vor.u32 %v1316_v19, %v963_v18  ;;  %v1319_v25 = vld [vmem:[#allocation5 + $0x74] sm:$0xf] }
  0x1c   :  { %v1091_v22 = vld [vmem:[#allocation5 + $0x150] sm:$0xf]  ;;  %v1348_v23 = vld [vmem:[#allocation5 + $0x154] sm:$0xf0]  ;;  %v981_v26 = vld [vmem:[#allocation5 + $0x78] sm:$0xf0]  ;;  %v1028_v27 = vor.u32 %v1332_v21, %v1027_v20 }
  0x1d   :  { %402 = vmatpush.bf16.msra.mxu0 %v972_v12  ;;  %v1092_v28 = vor.u32 %v1348_v23, %v1091_v22  ;;  %v955_v29 = vld [vmem:[#allocation5 + $0x40] sm:$0xf]  ;;  %v1314_v30 = vld [vmem:[#allocation5 + $0x44] sm:$0xf0]  ;;  %v984_v32 = vor.u32 %v1319_v25, %v981_v26  ;;  %v1317_v36 = vld [vmem:[#allocation5 + $0x64] sm:$0xf] }
  0x1e   :  { %415 = vmatpush.bf16.msra.mxu1 %v1036_v16  ;;  %v1019_v31 = vld [vmem:[#allocation5 + $0xc0] sm:$0xf]  ;;  %v1330_v33 = vld [vmem:[#allocation5 + $0xc4] sm:$0xf0]  ;;  %v973_v37 = vld [vmem:[#allocation5 + $0x68] sm:$0xf0]  ;;  %v956_v38 = vor.u32 %v1314_v30, %v955_v29 }
  0x1f   :  { %428 = vmatpush.bf16.msra.mxu2 %v1100_v17  ;;  %v1083_v34 = vld [vmem:[#allocation5 + $0x140] sm:$0xf]  ;;  %v1346_v35 = vld [vmem:[#allocation5 + $0x144] sm:$0xf0]  ;;  %440 = vmatpush.bf16.msra.mxu3 %v984_v32  ;;  %v947_v39 = vld [vmem:[#allocation5 + $0x30] sm:$0xf]  ;;  %v976_v41 = vor.u32 %v1317_v36, %v973_v37  ;;  %v1020_v42 = vor.u32 %v1330_v33, %v1019_v31 }
  0x20   :  { %v1312_v40 = vld [vmem:[#allocation5 + $0x34] sm:$0xf0]  ;;  %v1084_v43 = vor.u32 %v1346_v35, %v1083_v34  ;;  %v1011_v44 = vld [vmem:[#allocation5 + $0xb0] sm:$0xf]  ;;  %v1315_v46 = vld [vmem:[#allocation5 + $0x54] sm:$0xf] }
  0x21   :  { %403 = vmatpush.bf16.msra.mxu0 %v964_v24  ;;  %v1328_v45 = vld [vmem:[#allocation5 + $0xb4] sm:$0xf0]  ;;  %v1075_v47 = vld [vmem:[#allocation5 + $0x130] sm:$0xf]  ;;  %v965_v49 = vld [vmem:[#allocation5 + $0x58] sm:$0xf0]  ;;  %v948_v51 = vor.u32 %v1312_v40, %v947_v39 }
  0x22   :  { %416 = vmatpush.bf16.msra.mxu1 %v1028_v27  ;;  %v1344_v48 = vld [vmem:[#allocation5 + $0x134] sm:$0xf0]  ;;  %v968_v50 = vor.u32 %v1315_v46, %v965_v49  ;;  %v1313_v52 = vld [vmem:[#allocation5 + $0x44] sm:$0xf]  ;;  %v957_v53 = vld [vmem:[#allocation5 + $0x48] sm:$0xf0]  ;;  %v1012_v54 = vor.u32 %v1328_v45, %v1011_v44 }
  0x23   :  { %429 = vmatpush.bf16.msra.mxu2 %v1092_v28  ;;  %441 = vmatpush.bf16.msra.mxu3 %v976_v41  ;;  %v1076_v55 = vor.u32 %v1344_v48, %v1075_v47  ;;  %v939_v56 = vld [vmem:[#allocation5 + $0x20] sm:$0xf]  ;;  %v1310_v57 = vld [vmem:[#allocation5 + $0x24] sm:$0xf0]  ;;  %v960_v62 = vor.u32 %v1313_v52, %v957_v53  ;;  %v1311_v0 = vld [vmem:[#allocation5 + $0x34] sm:$0xf] }
  0x24   :  { %v1003_v58 = vld [vmem:[#allocation5 + $0xa0] sm:$0xf]  ;;  %v1326_v59 = vld [vmem:[#allocation5 + $0xa4] sm:$0xf0]  ;;  %v940_v63 = vor.u32 %v1310_v57, %v939_v56  ;;  %v949_v1 = vld [vmem:[#allocation5 + $0x38] sm:$0xf0] }
  0x25   :  { %404 = vmatpush.bf16.msra.mxu0 %v956_v38  ;;  %v1067_v60 = vld [vmem:[#allocation5 + $0x120] sm:$0xf]  ;;  %v1342_v61 = vld [vmem:[#allocation5 + $0x124] sm:$0xf0]  ;;  %v1004_v2 = vor.u32 %v1326_v59, %v1003_v58  ;;  %v931_v4 = vld [vmem:[#allocation5 + $0x10] sm:$0xf]  ;;  %v952_v10 = vor.u32 %v1311_v0, %v949_v1 }
  0x26   :  { %417 = vmatpush.bf16.msra.mxu1 %v1020_v42  ;;  %v1068_v3 = vor.u32 %v1342_v61, %v1067_v60  ;;  %v1308_v5 = vld [vmem:[#allocation5 + $0x14] sm:$0xf0]  ;;  %v995_v6 = vld [vmem:[#allocation5 + $0x90] sm:$0xf]  ;;  %v923_v12 = vld [vmem:[#allocation5] sm:$0xf] }
  0x27   :  { %430 = vmatpush.bf16.msra.mxu2 %v1084_v43  ;;  %442 = vmatpush.bf16.msra.mxu3 %v968_v50  ;;  %v1324_v7 = vld [vmem:[#allocation5 + $0x94] sm:$0xf0]  ;;  %v1059_v8 = vld [vmem:[#allocation5 + $0x110] sm:$0xf]  ;;  %v932_v11 = vor.u32 %v1308_v5, %v931_v4  ;;  %v1309_v13 = vld [vmem:[#allocation5 + $0x24] sm:$0xf] }
  0x28   :  { %v1340_v9 = vld [vmem:[#allocation5 + $0x114] sm:$0xf0]  ;;  %v941_v14 = vld [vmem:[#allocation5 + $0x28] sm:$0xf0]  ;;  %v996_v15 = vor.u32 %v1324_v7, %v995_v6  ;;  %v1306_v17 = vld [vmem:[#allocation5 + $0x4] sm:$0xf0] }
  0x29   :  { %405 = vmatpush.bf16.msra.mxu0 %v948_v51  ;;  %v1060_v16 = vor.u32 %v1340_v9, %v1059_v8  ;;  %v987_v18 = vld [vmem:[#allocation5 + $0x80] sm:$0xf]  ;;  %v1322_v19 = vld [vmem:[#allocation5 + $0x84] sm:$0xf0]  ;;  %v1335_v20 = vld [vmem:[#allocation5 + $0xf4] sm:$0xf]  ;;  %v944_v26 = vor.u32 %v1309_v13, %v941_v14  ;;  %v924_v27 = vor.u32 %v1306_v17, %v923_v12 }
  0x2a   :  { %418 = vmatpush.bf16.msra.mxu1 %v1012_v54  ;;  %v1045_v21 = vld [vmem:[#allocation5 + $0xf8] sm:$0xf0]  ;;  %v1351_v22 = vld [vmem:[#allocation5 + $0x174] sm:$0xf]  ;;  %v1051_v24 = vld [vmem:[#allocation5 + $0x100] sm:$0xf]  ;;  %v988_v31 = vor.u32 %v1322_v19, %v987_v18 }
  0x2b   :  { %431 = vmatpush.bf16.msra.mxu2 %v1076_v55  ;;  %443 = vmatpush.bf16.msra.mxu3 %v960_v62  ;;  %v1109_v23 = vld [vmem:[#allocation5 + $0x178] sm:$0xf0]  ;;  %v1338_v25 = vld [vmem:[#allocation5 + $0x104] sm:$0xf0]  ;;  %v1307_v29 = vld [vmem:[#allocation5 + $0x14] sm:$0xf]  ;;  %v1048_v32 = vor.u32 %v1335_v20, %v1045_v21 }
  0x2c   :  { %v101_v28 = vld [vmem:[#allocation2] sm:$0xff]  ;;  %v933_v30 = vld [vmem:[#allocation5 + $0x18] sm:$0xf0]  ;;  %v102_v33 = vld [vmem:[#allocation2 + $0x8] sm:$0xff]  ;;  %v1112_v34 = vor.u32 %v1351_v22, %v1109_v23  ;;  %v1052_v35 = vor.u32 %v1338_v25, %v1051_v24  ;;  %s909_s9 = sshll.u32 %s1653_s7, 4  ;;  %s910_s9 = int_to_ptr.hbm [resolvable:$true] %s909_s9 }
  0x2d   :  { %406 = vmatpush.bf16.msra.mxu0 %v940_v63  ;;  %v1333_v36 = vld [vmem:[#allocation5 + $0xe4] sm:$0xf]  ;;  %v1037_v37 = vld [vmem:[#allocation5 + $0xe8] sm:$0xf0]  ;;  %v103_v38 = vld [vmem:[#allocation2 + $0x10] sm:$0xff]  ;;  %v104_v41 = vpack.c.bf16 %v101_v28, %v101_v28  ;;  %v936_v42 = vor.u32 %v1307_v29, %v933_v30  ;;  %v1629_v43 = vpack.c.bf16 %v102_v33, %v102_v33 }
  0x2e   :  { %419 = vmatpush.bf16.msra.mxu1 %v1004_v2  ;;  %v1349_v39 = vld [vmem:[#allocation5 + $0x164] sm:$0xf]  ;;  %v1101_v40 = vld [vmem:[#allocation5 + $0x168] sm:$0xf0]  ;;  %v1040_v46 = vor.u32 %v1333_v36, %v1037_v37  ;;  %v1631_v47 = vpack.c.bf16 %v103_v38, %v103_v38  ;;  %v1331_v48 = vld [vmem:[#allocation5 + $0xd4] sm:$0xf] }
  0x2f   :  { %432 = vmatpush.bf16.msra.mxu2 %v1068_v3  ;;  %444 = vmatpush.bf16.msra.mxu3 %v952_v10  ;;  %v1305_v44 = vld [vmem:[#allocation5 + $0x4] sm:$0xf]  ;;  %v925_v45 = vld [vmem:[#allocation5 + $0x8] sm:$0xf0]  ;;  %v1104_v49 = vor.u32 %v1349_v39, %v1101_v40  ;;  %v1029_v50 = vld [vmem:[#allocation5 + $0xd8] sm:$0xf0] }
  0x30   :  { %v1171_v51 = vld [vmem:[#allocation8 + $0x70] sm:$0xf]  ;;  %v1368_v52 = vld [vmem:[#allocation8 + $0x74] sm:$0xf0]  ;;  %v928_v55 = vor.u32 %v1305_v44, %v925_v45  ;;  %v1163_v57 = vld [vmem:[#allocation8 + $0x60] sm:$0xf]  ;;  %v1032_v59 = vor.u32 %v1331_v48, %v1029_v50 }
  0x31   :  { %407 = vmatpush.bf16.msra.mxu0 %v932_v11  ;;  %v1347_v53 = vld [vmem:[#allocation5 + $0x154] sm:$0xf]  ;;  %v1093_v54 = vld [vmem:[#allocation5 + $0x158] sm:$0xf0]  ;;  %v1172_v56 = vor.u32 %v1368_v52, %v1171_v51  ;;  %v1366_v58 = vld [vmem:[#allocation8 + $0x64] sm:$0xf0] }
  0x32   :  { %420 = vmatpush.bf16.msra.mxu1 %v996_v15  ;;  %v1096_v60 = vor.u32 %v1347_v53, %v1093_v54  ;;  %v1329_v61 = vld [vmem:[#allocation5 + $0xc4] sm:$0xf]  ;;  %v1021_v62 = vld [vmem:[#allocation5 + $0xc8] sm:$0xf0]  ;;  %v1164_v1 = vor.u32 %v1366_v58, %v1163_v57  ;;  %v1155_v2 = vld [vmem:[#allocation8 + $0x50] sm:$0xf] }
  0x33   :  { %433 = vmatpush.bf16.msra.mxu2 %v1060_v16  ;;  %445 = vmatpush.bf16.msra.mxu3 %v944_v26  ;;  %v1345_v63 = vld [vmem:[#allocation5 + $0x144] sm:$0xf]  ;;  %v1085_v0 = vld [vmem:[#allocation5 + $0x148] sm:$0xf0]  ;;  %v1364_v3 = vld [vmem:[#allocation8 + $0x54] sm:$0xf0]  ;;  %v1024_v4 = vor.u32 %v1329_v61, %v1021_v62 }
  0x34   :  { %v1088_v5 = vor.u32 %v1345_v63, %v1085_v0  ;;  %v1327_v6 = vld [vmem:[#allocation5 + $0xb4] sm:$0xf]  ;;  %v1013_v7 = vld [vmem:[#allocation5 + $0xb8] sm:$0xf0]  ;;  %v1156_v10 = vor.u32 %v1364_v3, %v1155_v2  ;;  %v1147_v11 = vld [vmem:[#allocation8 + $0x40] sm:$0xf] }
  0x35   :  { %408 = vmatpush.bf16.msra.mxu0 %v924_v27  ;;  %v1343_v8 = vld [vmem:[#allocation5 + $0x134] sm:$0xf]  ;;  %v1077_v9 = vld [vmem:[#allocation5 + $0x138] sm:$0xf0]  ;;  %v1362_v12 = vld [vmem:[#allocation8 + $0x44] sm:$0xf0]  ;;  %v1016_v13 = vor.u32 %v1327_v6, %v1013_v7 }
  0x36   :  { %421 = vmatpush.bf16.msra.mxu1 %v988_v31  ;;  %v1080_v14 = vor.u32 %v1343_v8, %v1077_v9  ;;  %v1325_v15 = vld [vmem:[#allocation5 + $0xa4] sm:$0xf]  ;;  %v1005_v16 = vld [vmem:[#allocation5 + $0xa8] sm:$0xf0]  ;;  %v1148_v19 = vor.u32 %v1362_v12, %v1147_v11  ;;  %v1139_v20 = vld [vmem:[#allocation8 + $0x30] sm:$0xf] }
  0x37   :  { %434 = vmatpush.bf16.msra.mxu2 %v1052_v35  ;;  %446 = vmatpush.bf16.msra.mxu3 %v936_v42  ;;  %v1341_v17 = vld [vmem:[#allocation5 + $0x124] sm:$0xf]  ;;  %v1069_v18 = vld [vmem:[#allocation5 + $0x128] sm:$0xf0]  ;;  %v1360_v21 = vld [vmem:[#allocation8 + $0x34] sm:$0xf0]  ;;  %v1008_v22 = vor.u32 %v1325_v15, %v1005_v16 }
  0x38   :  { %409 = vmatmul.bf16.vlgmr.msra.gmra.mxu0 %v104_v41  ;;  %v1072_v23 = vor.u32 %v1341_v17, %v1069_v18  ;;  %v1323_v24 = vld [vmem:[#allocation5 + $0x94] sm:$0xf]  ;;  %v997_v25 = vld [vmem:[#allocation5 + $0x98] sm:$0xf0]  ;;  %v1140_v28 = vor.u32 %v1360_v21, %v1139_v20  ;;  %v1321_v31 = vld [vmem:[#allocation5 + $0x84] sm:$0xf] }
  0x39   :  { %453 = vmatpush.bf16.msrb.mxu0 %v1048_v32  ;;  %422 = vmatmul.bf16.vlgmr.msra.gmra.mxu1 %v1629_v43  ;;  %v1339_v26 = vld [vmem:[#allocation5 + $0x114] sm:$0xf]  ;;  %v1061_v27 = vld [vmem:[#allocation5 + $0x118] sm:$0xf0]  ;;  %v1000_v29 = vor.u32 %v1323_v24, %v997_v25  ;;  %v989_v32 = vld [vmem:[#allocation5 + $0x88] sm:$0xf0] }
  0x3a   :  { %466 = vmatpush.bf16.msrb.mxu1 %v1112_v34  ;;  %435 = vmatmul.bf16.vlgmr.msra.gmra.mxu2 %v1631_v47  ;;  %v1064_v30 = vor.u32 %v1339_v26, %v1061_v27  ;;  %v1337_v33 = vld [vmem:[#allocation5 + $0x104] sm:$0xf]  ;;  %v1053_v34 = vld [vmem:[#allocation5 + $0x108] sm:$0xf0]  ;;  %v1367_v35 = vld [vmem:[#allocation8 + $0x74] sm:$0xf]  ;;  %v992_v37 = vor.u32 %v1321_v31, %v989_v32 }
  0x3b   :  { %681 = vmatpush.bf16.msrb.mxu2 %v1172_v56  ;;  %447 = vmatpush.bf16.msra.mxu3 %v928_v55  ;;  %v1173_v36 = vld [vmem:[#allocation8 + $0x78] sm:$0xf0]  ;;  %v1056_v38 = vor.u32 %v1337_v33, %v1053_v34  ;;  %v1365_v40 = vld [vmem:[#allocation8 + $0x64] sm:$0xf]  ;;  %v1363_v44 = vld [vmem:[#allocation8 + $0x54] sm:$0xf] }
  0x3c   :  { %v1176_v39 = vor.u32 %v1367_v35, %v1173_v36  ;;  %v1157_v45 = vld [vmem:[#allocation8 + $0x58] sm:$0xf0]  ;;  %v1361_v48 = vld [vmem:[#allocation8 + $0x44] sm:$0xf]  ;;  %v1359_v51 = vld [vmem:[#allocation8 + $0x34] sm:$0xf] }
  0x3d   :  { %454 = vmatpush.bf16.msrb.mxu0 %v1040_v46  ;;  %v1160_v46 = vor.u32 %v1363_v44, %v1157_v45  ;;  %v1141_v52 = vld [vmem:[#allocation8 + $0x38] sm:$0xf0]  ;;  %v1131_v54 = vld [vmem:[#allocation8 + $0x20] sm:$0xf]  ;;  %v1358_v55 = vld [vmem:[#allocation8 + $0x24] sm:$0xf0] }
  0x3e   :  { %467 = vmatpush.bf16.msrb.mxu1 %v1104_v49  ;;  %448 = vmatmul.bf16.vlgmr.msra.gmra.mxu3 %v104_v41  ;;  %v1165_v41 = vld [vmem:[#allocation8 + $0x68] sm:$0xf0]  ;;  %v1144_v53 = vor.u32 %v1359_v51, %v1141_v52  ;;  %v1357_v56 = vld [vmem:[#allocation8 + $0x24] sm:$0xf]  ;;  %v1132_v57 = vor.u32 %v1358_v55, %v1131_v54  ;;  %v1237_v62 = vld [vmem:[#allocation8 + $0xf8] sm:$0xf0] }
  0x3f   :  { %682 = vmatpush.bf16.msrb.mxu2 %v1164_v1  ;;  %v1168_v42 = vor.u32 %v1365_v40, %v1165_v41  ;;  %v1149_v49 = vld [vmem:[#allocation8 + $0x48] sm:$0xf0]  ;;  %v1123_v0 = vld [vmem:[#allocation8 + $0x10] sm:$0xf]  ;;  %v1356_v1 = vld [vmem:[#allocation8 + $0x14] sm:$0xf0] }
  0x40   :  { %v1152_v50 = vor.u32 %v1361_v48, %v1149_v49  ;;  %v1133_v58 = vld [vmem:[#allocation8 + $0x28] sm:$0xf0]  ;;  %v1355_v2 = vld [vmem:[#allocation8 + $0x14] sm:$0xf]  ;;  %v1124_v3 = vor.u32 %v1356_v1, %v1123_v0  ;;  %v1227_v6 = vld [vmem:[#allocation8 + $0xe0] sm:$0xf] }
  0x41   :  { %455 = vmatpush.bf16.msrb.mxu0 %v1032_v59  ;;  %v1136_v59 = vor.u32 %v1357_v56, %v1133_v58  ;;  %v1382_v7 = vld [vmem:[#allocation8 + $0xe4] sm:$0xf0]  ;;  %v1381_v8 = vld [vmem:[#allocation8 + $0xe4] sm:$0xf]  ;;  %v1115_v12 = vld [vmem:[#allocation8] sm:$0xf] }
  0x42   :  { %468 = vmatpush.bf16.msrb.mxu1 %v1096_v60  ;;  %v1384_v60 = vld [vmem:[#allocation8 + $0xf4] sm:$0xf0]  ;;  %v1228_v9 = vor.u32 %v1382_v7, %v1227_v6  ;;  %v1117_v16 = vld [vmem:[#allocation8 + $0x8] sm:$0xf0]  ;;  %v1219_v18 = vld [vmem:[#allocation8 + $0xd0] sm:$0xf] }
  0x43   :  { %683 = vmatpush.bf16.msrb.mxu2 %v1156_v10  ;;  %v1229_v10 = vld [vmem:[#allocation8 + $0xe8] sm:$0xf0]  ;;  %v1379_v20 = vld [vmem:[#allocation8 + $0xd4] sm:$0xf]  ;;  %v1211_v24 = vld [vmem:[#allocation8 + $0xc0] sm:$0xf] }
  0x44   :  { %v1232_v11 = vor.u32 %v1381_v8, %v1229_v10  ;;  %v1378_v25 = vld [vmem:[#allocation8 + $0xc4] sm:$0xf0]  ;;  %v1377_v27 = vld [vmem:[#allocation8 + $0xc4] sm:$0xf]  ;;  %v1376_v31 = vld [vmem:[#allocation8 + $0xb4] sm:$0xf0] }
  0x45   :  { %456 = vmatpush.bf16.msrb.mxu0 %v1024_v4  ;;  %v1125_v4 = vld [vmem:[#allocation8 + $0x18] sm:$0xf0]  ;;  %v1212_v26 = vor.u32 %v1378_v25, %v1211_v24  ;;  %v1375_v32 = vld [vmem:[#allocation8 + $0xb4] sm:$0xf]  ;;  %v1195_v36 = vld [vmem:[#allocation8 + $0xa0] sm:$0xf] }
  0x46   :  { %469 = vmatpush.bf16.msrb.mxu1 %v1088_v5  ;;  %v1128_v5 = vor.u32 %v1355_v2, %v1125_v4  ;;  %v1205_v33 = vld [vmem:[#allocation8 + $0xb8] sm:$0xf0]  ;;  %v1187_v45 = vld [vmem:[#allocation8 + $0x90] sm:$0xf]  ;;  %v1371_v48 = vld [vmem:[#allocation8 + $0x94] sm:$0xf] }
  0x47   :  { %684 = vmatpush.bf16.msrb.mxu2 %v1148_v19  ;;  %v1380_v19 = vld [vmem:[#allocation8 + $0xd4] sm:$0xf0]  ;;  %v1208_v35 = vor.u32 %v1375_v32, %v1205_v33  ;;  %v155_v41 = vld [vmem:[#allocation7] sm:$0x3]  ;;  %v1179_v55 = vld [vmem:[#allocation8 + $0x80] sm:$0xf] }
  0x48   :  { %v1220_v21 = vor.u32 %v1380_v19, %v1219_v18  ;;  %v157_v44 = vperm.slane %v155_v41, 0  ;;  %v1370_v56 = vld [vmem:[#allocation8 + $0x84] sm:$0xf0]  ;;  %v158_v6 = vperm.slane %v155_v41, 1  ;;  %v1391_v19 = vld [vmem:[#allocation10 + $0x30] sm:$0xff]  ;;  %v1388_v25 = vld [vmem:[#allocation10 + $0x18] sm:$0xff] }
  0x49   :  { %457 = vmatpush.bf16.msrb.mxu0 %v1016_v13  ;;  %v1354_v13 = vld [vmem:[#allocation8 + $0x4] sm:$0xf0]  ;;  %v1180_v58 = vor.u32 %v1370_v56, %v1179_v55  ;;  %v1395_v24 = vld [vmem:[#allocation10 + $0x50] sm:$0xff] }
  0x4a   :  { %470 = vmatpush.bf16.msrb.mxu1 %v1080_v14  ;;  %v1353_v14 = vld [vmem:[#allocation8 + $0x4] sm:$0xf]  ;;  %v1116_v15 = vor.u32 %v1354_v13, %v1115_v12  ;;  %v1398_v18 = vld [vmem:[#allocation10 + $0x68] sm:$0xff] }
  0x4b   :  { %685 = vmatpush.bf16.msrb.mxu2 %v1140_v28  ;;  %v1120_v17 = vor.u32 %v1353_v14, %v1117_v16  ;;  %v1213_v28 = vld [vmem:[#allocation8 + $0xc8] sm:$0xf0]  ;;  %v1399_v16 = vld [vmem:[#allocation10 + $0x70] sm:$0xff] }
  0x4d   :  { %458 = vmatpush.bf16.msrb.mxu0 %v1008_v22  ;;  %v1221_v22 = vld [vmem:[#allocation8 + $0xd8] sm:$0xf0] }
  0x4e   :  { %471 = vmatpush.bf16.msrb.mxu1 %v1072_v23  ;;  %v1224_v23 = vor.u32 %v1379_v20, %v1221_v22  ;;  %v1397_v20 = vld [vmem:[#allocation10 + $0x60] sm:$0xff]  ;;  %v1396_v22 = vld [vmem:[#allocation10 + $0x58] sm:$0xff] }
  0x4f   :  { %686 = vmatpush.bf16.msrb.mxu2 %v1132_v57  ;;  %v1369_v57 = vld [vmem:[#allocation8 + $0x84] sm:$0xf] }
  0x51   :  { %459 = vmatpush.bf16.msrb.mxu0 %v1000_v29  ;;  %v1216_v29 = vor.u32 %v1377_v27, %v1213_v28  ;;  %v1387_v27 = vld [vmem:[#allocation10 + $0x10] sm:$0xff]  ;;  %v1393_v28 = vld [vmem:[#allocation10 + $0x40] sm:$0xff] }
  0x52   :  { %472 = vmatpush.bf16.msrb.mxu1 %v1064_v30  ;;  %v1203_v30 = vld [vmem:[#allocation8 + $0xb0] sm:$0xf] }
  0x53   :  { %687 = vmatpush.bf16.msrb.mxu2 %v1124_v3  ;;  %v1204_v34 = vor.u32 %v1376_v31, %v1203_v30  ;;  %v1385_v31 = vld [vmem:[#allocation10] sm:$0xff] }
  0x55   :  { %460 = vmatpush.bf16.msrb.mxu0 %v992_v37  ;;  %v1374_v37 = vld [vmem:[#allocation8 + $0xa4] sm:$0xf0] }
  0x56   :  { %473 = vmatpush.bf16.msrb.mxu1 %v1056_v38  ;;  %v1373_v38 = vld [vmem:[#allocation8 + $0xa4] sm:$0xf]  ;;  %v1196_v40 = vor.u32 %v1374_v37, %v1195_v36 }
  0x57   :  { %688 = vmatpush.bf16.msrb.mxu2 %v1116_v15 }
  0x58   :  { %461 = vmatmul.bf16.vlgmr.msrb.gmra.mxu0 %v1629_v43  ;;  %v1235_v43 = vld [vmem:[#allocation8 + $0xf0] sm:$0xf] }
  0x59   :  { %707 = vmatpush.bf16.msra.mxu0 %v1176_v39  ;;  %474 = vmatmul.bf16.vlgmr.msrb.gmra.mxu1 %v1631_v47  ;;  %v1383_v47 = vld [vmem:[#allocation8 + $0xf4] sm:$0xf]  ;;  %v1236_v61 = vor.u32 %v1384_v60, %v1235_v43  ;;  %v1197_v39 = vld [vmem:[#allocation8 + $0xa8] sm:$0xf0] }
  0x5a   :  { %v1240_v63 = vor.u32 %v1383_v47, %v1237_v62  ;;  %v1400_v47 = vld [vmem:[#allocation10 + $0x78] sm:$0xff] }
  0x5b   :  { %694 = vmatpush.bf16.msrb.mxu3 %v1236_v61 }
  0x5c   :  { %720 = vmatpush.bf16.msra.mxu1 %v1240_v63 }
  0x5d   :  { %708 = vmatpush.bf16.msra.mxu0 %v1168_v42  ;;  %v1200_v42 = vor.u32 %v1373_v38, %v1197_v39 }
  0x5f   :  { %695 = vmatpush.bf16.msrb.mxu3 %v1228_v9 }
  0x60   :  { %721 = vmatpush.bf16.msra.mxu1 %v1232_v11 }
  0x61   :  { %709 = vmatpush.bf16.msra.mxu0 %v1160_v46  ;;  %v1372_v46 = vld [vmem:[#allocation8 + $0x94] sm:$0xf0] }
  0x62   :  { %v1188_v49 = vor.u32 %v1372_v46, %v1187_v45 }
  0x63   :  { %696 = vmatpush.bf16.msrb.mxu3 %v1220_v21  ;;  %v1390_v21 = vld [vmem:[#allocation10 + $0x28] sm:$0xff] }
  0x64   :  { %722 = vmatpush.bf16.msra.mxu1 %v1224_v23  ;;  %v1389_v23 = vld [vmem:[#allocation10 + $0x20] sm:$0xff] }
  0x65   :  { %710 = vmatpush.bf16.msra.mxu0 %v1152_v50  ;;  %v1189_v50 = vld [vmem:[#allocation8 + $0x98] sm:$0xf0] }
  0x66   :  { %v1192_v51 = vor.u32 %v1371_v48, %v1189_v50 }
  0x67   :  { %697 = vmatpush.bf16.msrb.mxu3 %v1212_v26  ;;  %v1394_v26 = vld [vmem:[#allocation10 + $0x48] sm:$0xff] }
  0x68   :  { %723 = vmatpush.bf16.msra.mxu1 %v1216_v29  ;;  %v1386_v29 = vld [vmem:[#allocation10 + $0x8] sm:$0xff] }
  0x69   :  { %711 = vmatpush.bf16.msra.mxu0 %v1144_v53 }
  0x6b   :  { %698 = vmatpush.bf16.msrb.mxu3 %v1204_v34 }
  0x6c   :  { %724 = vmatpush.bf16.msra.mxu1 %v1208_v35  ;;  %v515_v35 = vld [vmem:[%s1650_s4] sm:$0x3]  ;;  %s1573_s4 = smov [#allocation11]  }
  0x6d   :  { %712 = vmatpush.bf16.msra.mxu0 %v1136_v59  ;;  %v1181_v59 = vld [vmem:[#allocation8 + $0x88] sm:$0xf0]  ;;  %v518_v36 = vperm.slane %v515_v35, 1  ;;  %v517_v39 = vperm.slane %v515_v35, 0  ;;  %s907_s29 = sshll.u32 %s1573_s4, 4  ;;  %s908_s29 = int_to_ptr.vmem [resolvable:$true] %s907_s29 }
  0x6e   :  { %v1184_v43 = vor.u32 %v1369_v57, %v1181_v59 }
  0x6f   :  { %699 = vmatpush.bf16.msrb.mxu3 %v1196_v40 }
  0x70   :  { %725 = vmatpush.bf16.msra.mxu1 %v1200_v42 }
  0x71   :  { %713 = vmatpush.bf16.msra.mxu0 %v1128_v5 }
  0x73   :  { %700 = vmatpush.bf16.msrb.mxu3 %v1188_v49 }
  0x74   :  { %726 = vmatpush.bf16.msra.mxu1 %v1192_v51 }
  0x75   :  { %714 = vmatpush.bf16.msra.mxu0 %v1120_v17  ;;  %v1392_v17 = vld [vmem:[#allocation10 + $0x38] sm:$0xff] }
  0x76   :  { %869 = vmatpush.bf16.msra.mxu2 %v1392_v17 }
  0x77   :  { %701 = vmatpush.bf16.msrb.mxu3 %v1180_v58 }
  0x78   :  { %727 = vmatpush.bf16.msra.mxu1 %v1184_v43 }
  0x7a   :  { %870 = vmatpush.bf16.msra.mxu2 %v1391_v19 }
  0x7b   :  { %882 = vmatpush.bf16.msra.mxu3 %v1400_v47 }
  0x7e   :  { %871 = vmatpush.bf16.msra.mxu2 %v1390_v21 }
  0x7f   :  { %883 = vmatpush.bf16.msra.mxu3 %v1399_v16 }
  0x82   :  { %872 = vmatpush.bf16.msra.mxu2 %v1389_v23 }
  0x83   :  { %884 = vmatpush.bf16.msra.mxu3 %v1398_v18 }
  0x86   :  { %873 = vmatpush.bf16.msra.mxu2 %v1388_v25 }
  0x87   :  { %885 = vmatpush.bf16.msra.mxu3 %v1397_v20 }
  0x8a   :  { %874 = vmatpush.bf16.msra.mxu2 %v1387_v27 }
  0x8b   :  { %886 = vmatpush.bf16.msra.mxu3 %v1396_v22 }
  0x8e   :  { %875 = vmatpush.bf16.msra.mxu2 %v1386_v29 }
  0x8f   :  { %887 = vmatpush.bf16.msra.mxu3 %v1395_v24 }
  0x92   :  { %876 = vmatpush.bf16.msra.mxu2 %v1385_v31 }
  0x93   :  { %888 = vmatpush.bf16.msra.mxu3 %v1394_v26 }
  0x97   :  { %889 = vmatpush.bf16.msra.mxu3 %v1393_v28 }
  0xb5   :  { %v410_v52 = vpop.f32.mrf.mxu0 }
  0xb6   :  { %v411_v53 = vadd.f32 %v410_v52, %v157_v44  ;;  %v423_v54 = vpop.f32.mrf.mxu1 }
  0xb8   :  { %v424_v60 = vadd.f32 %v423_v54, %v411_v53  ;;  %v1411_v53 = vld [vmem:[%s1652_s6] ss:$0 sm:$0xff]  ;;  %v895_v54 = vlaneseq }
  0xba   :  { %v896_v58 = vand.u32 127, %v895_v54 }
  0xbc   :  { %vm899_vm0 = vcmp.ge.s32.totalorder %v896_v58, 17 }
  0xbd   :  { %v436_v61 = vpop.f32.mrf.mxu2  ;;  %v412_v62 = vpop.f32.mrf.mxu0 }
  0xbe   :  { %v437_v63 = vadd.f32 %v436_v61, %v424_v60  ;;  %v425_v0 = vpop.f32.mrf.mxu1 }
  0xc0   :  { %v479_v1 = vmax.f32 %v437_v63, 0.0 }
  0xc1   :  { %v449_v3 = vpop.f32.mrf.mxu3 }
  0xc2   :  { %v481_v2 = vpack.c.bf16 %v479_v1, %v479_v1  ;;  %v450_v7 = vadd.f32 %v449_v3, %v158_v6 }
  0xc4   :  { %689 = vmatmul.bf16.vlgmr.msrb.gmra.mxu2 %v481_v2  ;;  %715 = vmatmul.bf16.vlgmr.msra.gmra.mxu0 %v481_v2 }
  0xc5   :  { %v438_v4 = vpop.f32.mrf.mxu2 }
  0xc9   :  { %v451_v5 = vpop.f32.mrf.mxu3 }
  0xd5   :  { %v462_v8 = vpop.f32.mrf.mxu0 }
  0xd6   :  { %v463_v9 = vadd.f32 %v462_v8, %v450_v7  ;;  %v475_v10 = vpop.f32.mrf.mxu1 }
  0xd8   :  { %v476_v11 = vadd.f32 %v475_v10, %v463_v9 }
  0xda   :  { %v480_v12 = vmax.f32 %v476_v11, 0.0 }
  0xdc   :  { %v482_v13 = vpack.c.bf16 %v480_v12, %v480_v12 }
  0xdd   :  { %v464_v14 = vpop.f32.mrf.mxu0 }
  0xde   :  { %v477_v15 = vpop.f32.mrf.mxu1  ;;  %702 = vmatmul.bf16.vlgmr.msrb.gmra.mxu3 %v482_v13  ;;  %728 = vmatmul.bf16.vlgmr.msra.gmra.mxu1 %v482_v13 }
 0x141   :  { %v716_v30 = vpop.f32.mrf.mxu0 }
 0x142   :  { %v717_v37 = vadd.f32 %v716_v30, %v518_v36 }
 0x147   :  { %v690_v32 = vpop.f32.mrf.mxu2 }
 0x148   :  { %v691_v42 = vadd.f32 %v690_v32, %v517_v39 }
 0x149   :  { %v718_v33 = vpop.f32.mrf.mxu0 }
 0x14f   :  { %v692_v34 = vpop.f32.mrf.mxu2 }
 0x15b   :  { %v729_v38 = vpop.f32.mrf.mxu1 }
 0x15c   :  { %v730_v40 = vadd.f32 %v729_v38, %v717_v37 }
 0x15e   :  { %v734_v41 = vmax.f32 %v730_v40, 0.0 }
 0x160   :  { %v736_v44 = vpack.c.bf16 %v734_v41, %v734_v41 }
 0x161   :  { %v703_v45 = vpop.f32.mrf.mxu3 }
 0x162   :  { %v704_v46 = vadd.f32 %v703_v45, %v691_v42  ;;  %890 = vmatmul.bf16.vlgmr.msra.gmra.mxu3 %v736_v44 }
 0x163   :  { %v731_v48 = vpop.f32.mrf.mxu1 }
 0x164   :  { %v733_v49 = vmax.f32 %v704_v46, 0.0 }
 0x166   :  { %v735_v50 = vpack.c.bf16 %v733_v49, %v733_v49 }
 0x168   :  { %877 = vmatmul.bf16.vlgmr.msra.gmra.mxu2 %v735_v50 }
 0x169   :  { %v705_v51 = vpop.f32.mrf.mxu3 }
 0x1e5   :  { %v891_v52 = vpop.f32.mrf.mxu3 }
 0x1eb   :  { %v878_v55 = vpop.f32.mrf.mxu2 }
 0x1ec   :  { %v879_v56 = vadd.f32 %v1411_v53, %v878_v55 }
 0x1ed   :  { %v893_v57 = vpop.f32.mrf.mxu3 }
 0x1ee   :  { %v892_v59 = vadd.f32 %v891_v52, %v879_v56 }
 0x1f0   :  { %v897_v43 = vmax.f32 %v892_v59, -20.0 }
 0x1f2   :  { %v898_v60 = vmin.f32 %v897_v43, 2.0 }
 0x1f3   :  { %v880_v47 = vpop.f32.mrf.mxu2 }
 0x1f4   :  { %v900_v61 = vsel %vm899_vm0, %v898_v60, %v892_v59 }
 0x1f5   :  { %901 = vst [vmem:[#allocation11] sm:$0xff] %v900_v61 }
 0x1f6   :  { %912 = dma.vmem_to_hbm [thread:$0]  %s908_s29, 128, %s910_s9, [#allocation4]  }
 0x1f7   :  { %1562 = dma.done.wait [#allocation4], 128  }
 0x1f8   :  { %1563 = vsyncadd [#allocation4], 4294967168 }
 0x1f9   :  { %917 = vsyncpa [#allocation3], 1 }
 0x1fa   :  { %918 = vsyncpa [#allocation6], 1 }
 0x1fb   :  { %919 = vsyncpa [#allocation9], 1 }
 0x1fc   :  { %920 = vsyncpa [#allocation4], 1 }

</bundles_post_ra>
